<compile_context>
chip_gen: v6e
topology: v6e:2x2x1
jax: 0.10.0
libtpu: 0.0.40
codegen_flags: <defaults>
</compile_context>

<pallas_src>
import functools

import jax
import jax.numpy as jnp
from jax.experimental import pallas as pl
from jax.experimental.pallas import tpu as pltpu


def _round_up(n, m):
    return ((n + m - 1) // m) * m


def _num_tensorcores():
    """Best-effort count of TensorCores on the local device (v7x has 2)."""
    try:
        return max(1, int(getattr(jax.devices()[0], "num_cores", 1)))
    except Exception:  # perf heuristic only; never fail the kernel over it
        return 1


def mlp_kernel(x_ref, w1_ref, b1_ref, w2_ref, b2_ref, o_ref):
    # Layer 1: cast f32 activations to bf16 in-kernel (hidden under DMA/MXU),
    # run the MXU with f32 accumulation.
    x_bf = x_ref[...].astype(jnp.bfloat16)
    h = jnp.dot(x_bf, w1_ref[...], preferred_element_type=jnp.float32)
    # Bias + ReLU in f32 on the VPU (v5e has no bf16 VPU).
    h = jnp.maximum(h + b1_ref[...], 0.0)
    # Layer 2: bf16 operands, f32 accumulation, lane-dense 128-wide output.
    y = jnp.dot(h.astype(w2_ref.dtype), w2_ref[...],
                preferred_element_type=jnp.float32)
    o_ref[...] = (y + b2_ref[...]).astype(o_ref.dtype)


def prepare_params(w1_t, b1, w2_t, b2):
    """One-time weight prep, hoisted out of the per-call forward path.

    w1_t: (in, hidden), b1: (hidden,) or (1, hidden)
    w2_t: (hidden, out), b2: (out,) or (1, out)
    Returns bf16 matmul weights with fc2 padded to a lane-dense multiple of
    128, f32 biases, and the true output width.
    """
    out_dim = w2_t.shape[1]
    n_pad = _round_up(max(out_dim, 128), 128)
    b1 = jnp.asarray(b1, jnp.float32).reshape(1, -1)
    b2 = jnp.asarray(b2, jnp.float32).reshape(1, -1)
    w2_p = jnp.pad(w2_t, ((0, 0), (0, n_pad - out_dim)))
    b2_p = jnp.pad(b2, ((0, 0), (0, n_pad - out_dim)))
    return (w1_t.astype(jnp.bfloat16), b1,
            w2_p.astype(jnp.bfloat16), b2_p, out_dim)


@functools.partial(jax.jit, static_argnames=("out_dim", "block_m"))
def mlp_forward(x, w1_bf, b1, w2_bf, b2_p, *, out_dim, block_m=None):
    """x: (B, in) f32; params from prepare_params(); returns (B, out_dim) f32."""
    B, in_dim = x.shape
    hidden = w1_bf.shape[1]
    n_pad = w2_bf.shape[1]

    # --- Generation-aware batch tile (all Python ints at trace time).
    n_cores = _num_tensorcores()
    if block_m is None:
        if n_cores <= 1:
            # Single TC (v5e/v6e): one grid step, avoid per-step overhead.
            bm = min(_round_up(B, 8), 512)
        else:
            # Multi TC (v7x): even split so both cores stay busy.
            bm = min(_round_up(pl.cdiv(B, n_cores), 8), 512)
    else:
        bm = min(block_m, _round_up(B, 8))
    grid = (pl.cdiv(B, bm),)

    # --- VMEM guard: double-buffered x/out tiles + (default double-buffered)
    # resident weights must fit v7x's 64 MiB with headroom.
    vmem_bytes = 2 * (bm * in_dim * 4 + bm * n_pad * 4
                      + in_dim * hidden * 2 + hidden * 4
                      + hidden * n_pad * 2 + n_pad * 4)
    assert vmem_bytes < 48 * 1024 * 1024, (
        "resident weights exceed the v7x VMEM budget; K-tile the reduction "
        "axis instead of keeping full weights resident")
    # TODO(synk): if in_dim/hidden grow to >=4K, tile the K axis with a VMEM
    # accumulator and single-buffer the constant weight blocks
    # (pipeline_mode=pl.Buffered(1)) instead of full-resident weights.

    cost = pl.CostEstimate(
        flops=2 * B * in_dim * hidden + 2 * B * hidden * n_pad,
        transcendentals=0,
        bytes_accessed=(x.size * 4 + w1_bf.size * 2 + b1.size * 4
                        + w2_bf.size * 2 + b2_p.size * 4 + B * n_pad * 4),
    )

    out_padded = pl.pallas_call(
        mlp_kernel,
        out_shape=jax.ShapeDtypeStruct((B, n_pad), jnp.float32),
        grid=grid,
        in_specs=[
            # batch tile of the (f32) input
            pl.BlockSpec((bm, in_dim), lambda i: (i, 0)),
            # full weights / biases, resident across the (parallel) batch grid
            pl.BlockSpec((in_dim, hidden), lambda i: (0, 0)),
            pl.BlockSpec((1, hidden), lambda i: (0, 0)),
            pl.BlockSpec((hidden, n_pad), lambda i: (0, 0)),
            pl.BlockSpec((1, n_pad), lambda i: (0, 0)),
        ],
        out_specs=pl.BlockSpec((bm, n_pad), lambda i: (i, 0)),
        compiler_params=pltpu.CompilerParams(
            dimension_semantics=("parallel",)),
        cost_estimate=cost,
    )(x, w1_bf, b1, w2_bf, b2_p)

    # Slice the padded lanes off (free layout plumbing; consumers that can use
    # the lane-dense (B, 128) slab directly should skip this).
    return out_padded[:, :out_dim]


def init_mlp_params(key, input_size, hidden_size, output_size=10):
    """Deterministic init mirroring nn.Linear's uniform(-1/sqrt(fan_in), ...)."""
    k1, k2, k3, k4 = jax.random.split(key, 4)
    bound1 = 1.0 / jnp.sqrt(jnp.float32(input_size))
    bound2 = 1.0 / jnp.sqrt(jnp.float32(hidden_size))
    # PyTorch stores weight as (out, in); we keep the transposed (in, out)
    # layout so the kernel does x @ W directly.
    w1_t = jax.random.uniform(k1, (input_size, hidden_size),
                              jnp.float32, -bound1, bound1)
    b1 = jax.random.uniform(k2, (1, hidden_size), jnp.float32, -bound1, bound1)
    w2_t = jax.random.uniform(k3, (hidden_size, output_size),
                              jnp.float32, -bound2, bound2)
    b2 = jax.random.uniform(k4, (1, output_size), jnp.float32, -bound2, bound2)
    return w1_t, b1, w2_t, b2


if __name__ == "__main__":
    # Small MNIST-MLP-shaped problem: batch=32, input=64, hidden=32, out=10.
    batch, input_size, hidden_size, output_size = 32, 64, 32, 10

    key = jax.random.PRNGKey(0)
    kx, kp = jax.random.split(key)
    x = jax.random.normal(kx, (batch, input_size), jnp.float32)
    w1_t, b1, w2_t, b2 = init_mlp_params(kp, input_size, hidden_size,
                                         output_size)

    # One-time param prep (pad + bf16 cast) hoisted out of the per-call path.
    w1_bf, b1_p, w2_bf, b2_p, out_dim = prepare_params(w1_t, b1, w2_t, b2)
    (w1_bf, b1_p, w2_bf, b2_p) = jax.block_until_ready(
        (w1_bf, b1_p, w2_bf, b2_p))

    out = mlp_forward(x, w1_bf, b1_p, w2_bf, b2_p, out_dim=out_dim)
    out = jax.block_until_ready(out)
    assert out.shape == (batch, output_size)

    # Cross-check against a plain-JAX f32 reference of the same forward pass.
    # Tolerance relaxed because the kernel matmuls use bf16 operands
    # (f32 accumulation).
    ref = jnp.maximum(x @ w1_t + b1, 0.0) @ w2_t + b2
    assert jnp.allclose(out, ref, atol=5e-2, rtol=5e-2), (
        float(jnp.max(jnp.abs(out - ref))))

    print("KERNEL_OK")
</pallas_src>

<mosaic_0001>
module attributes {stable_mosaic.version = 11 : i64} {
  func.func @mlp_kernel(%arg0: i32, %arg1: memref<32x64xf32, #tpu.memory_space<vmem>>, %arg2: memref<64x32xbf16, #tpu.memory_space<vmem>>, %arg3: memref<1x32xf32, #tpu.memory_space<vmem>>, %arg4: memref<32x128xbf16, #tpu.memory_space<vmem>>, %arg5: memref<1x128xf32, #tpu.memory_space<vmem>>, %arg6: memref<32x128xf32, #tpu.memory_space<vmem>>) attributes {dimension_semantics = [#tpu.dimension_semantics<parallel>], iteration_bounds = array<i64: 1>, scalar_prefetch = 0 : i64, scratch_operands = 0 : i64, tpu.core_type = #tpu.core_type<tc>, window_params = [{transform_indices = @transform_0, window_bounds = array<i64: 32, 64>}, {pipeline_mode = #tpu.pipeline_mode<synchronous>, transform_indices = @transform_1, window_bounds = array<i64: 64, 32>}, {pipeline_mode = #tpu.pipeline_mode<synchronous>, transform_indices = @transform_2, window_bounds = array<i64: 1, 32>}, {pipeline_mode = #tpu.pipeline_mode<synchronous>, transform_indices = @transform_3, window_bounds = array<i64: 32, 128>}, {pipeline_mode = #tpu.pipeline_mode<synchronous>, transform_indices = @transform_4, window_bounds = array<i64: 1, 128>}, {transform_indices = @transform_5, window_bounds = array<i64: 32, 128>}]} {
    %c0 = arith.constant 0 : index
    %c0_0 = arith.constant 0 : index
    %0 = vector.load %arg1[%c0, %c0_0] : memref<32x64xf32, #tpu.memory_space<vmem>>, vector<32x64xf32>
    %1 = arith.truncf %0 : vector<32x64xf32> to vector<32x64xbf16>
    %c0_1 = arith.constant 0 : index
    %c0_2 = arith.constant 0 : index
    %2 = vector.load %arg2[%c0_1, %c0_2] : memref<64x32xbf16, #tpu.memory_space<vmem>>, vector<64x32xbf16>
    %cst = arith.constant dense<0.000000e+00> : vector<32x32xf32>
    %3 = tpu.matmul %1, %2, %cst {dimension_numbers = #tpu.dot_dimension_numbers<[1], [0], [0], [1], [0, 0, 1, 1], [], []>} : vector<32x64xbf16>, vector<64x32xbf16>, vector<32x32xf32> -> vector<32x32xf32>
    %c0_3 = arith.constant 0 : index
    %c0_4 = arith.constant 0 : index
    %4 = vector.load %arg3[%c0_3, %c0_4] : memref<1x32xf32, #tpu.memory_space<vmem>>, vector<1x32xf32>
    %5 = vector.broadcast %4 : vector<1x32xf32> to vector<32x32xf32>
    %6 = arith.addf %3, %5 : vector<32x32xf32>
    %cst_5 = arith.constant 0.000000e+00 : f32
    %7 = vector.broadcast %cst_5 : f32 to vector<32x32xf32>
    %8 = arith.maximumf %6, %7 : vector<32x32xf32>
    %9 = arith.truncf %8 : vector<32x32xf32> to vector<32x32xbf16>
    %c0_6 = arith.constant 0 : index
    %c0_7 = arith.constant 0 : index
    %10 = vector.load %arg4[%c0_6, %c0_7] : memref<32x128xbf16, #tpu.memory_space<vmem>>, vector<32x128xbf16>
    %cst_8 = arith.constant dense<0.000000e+00> : vector<32x128xf32>
    %11 = tpu.matmul %9, %10, %cst_8 {dimension_numbers = #tpu.dot_dimension_numbers<[1], [0], [0], [1], [0, 0, 1, 1], [], []>} : vector<32x32xbf16>, vector<32x128xbf16>, vector<32x128xf32> -> vector<32x128xf32>
    %c0_9 = arith.constant 0 : index
    %c0_10 = arith.constant 0 : index
    %12 = vector.load %arg5[%c0_9, %c0_10] : memref<1x128xf32, #tpu.memory_space<vmem>>, vector<1x128xf32>
    %13 = vector.broadcast %12 : vector<1x128xf32> to vector<32x128xf32>
    %14 = arith.addf %11, %13 : vector<32x128xf32>
    %c0_11 = arith.constant 0 : index
    %c0_12 = arith.constant 0 : index
    %15 = vector.load %arg6[%c0_11, %c0_12] : memref<32x128xf32, #tpu.memory_space<vmem>>, vector<32x128xf32>
    tpu.vector_store %arg6[%c0_11, %c0_12], %14 {strides = array<i32>} : memref<32x128xf32, #tpu.memory_space<vmem>>, vector<32x128xf32>,
    return
  }
  func.func @transform_0(%arg0: i32) -> (i32, i32) {
    %c0_i32 = arith.constant 0 : i32
    %c0_i32_0 = arith.constant 0 : i32
    return %arg0, %c0_i32 : i32, i32
  }
  func.func @transform_1(%arg0: i32) -> (i32, i32) {
    %c0_i32 = arith.constant 0 : i32
    %c0_i32_0 = arith.constant 0 : i32
    %c0_i32_1 = arith.constant 0 : i32
    return %c0_i32, %c0_i32_0 : i32, i32
  }
  func.func @transform_2(%arg0: i32) -> (i32, i32) {
    %c0_i32 = arith.constant 0 : i32
    %c0_i32_0 = arith.constant 0 : i32
    %c0_i32_1 = arith.constant 0 : i32
    return %c0_i32, %c0_i32_0 : i32, i32
  }
  func.func @transform_3(%arg0: i32) -> (i32, i32) {
    %c0_i32 = arith.constant 0 : i32
    %c0_i32_0 = arith.constant 0 : i32
    %c0_i32_1 = arith.constant 0 : i32
    return %c0_i32, %c0_i32_0 : i32, i32
  }
  func.func @transform_4(%arg0: i32) -> (i32, i32) {
    %c0_i32 = arith.constant 0 : i32
    %c0_i32_0 = arith.constant 0 : i32
    %c0_i32_1 = arith.constant 0 : i32
    return %c0_i32, %c0_i32_0 : i32, i32
  }
  func.func @transform_5(%arg0: i32) -> (i32, i32) {
    %c0_i32 = arith.constant 0 : i32
    %c0_i32_0 = arith.constant 0 : i32
    return %arg0, %c0_i32 : i32, i32
  }
}

</mosaic_0001>

<bundles_post_ra>
// kernel: mlp_forward.1
= control target key start
LH: loop header
LB: loop body
LE: loop exit
PB: predicated region body
PF: predicated region fallthrough
CT: control target
= control target key end

     0   :  { %vm66_vm0 = vcmask 523264   ;;  %vm151_vm1 = vcmask 261120   ;;  %s341_s1 = inlined_call_operand.vmem [shape: bf16[64,32], index: 1, kind: input, shape index: {}]   ;;  %s342_s0 = inlined_call_operand.vmem [shape: f32[32,64], index: 0, kind: input, shape index: {}]   ;;  %s343_s3 = inlined_call_operand.vmem [shape: bf16[32,128], index: 3, kind: input, shape index: {}]   ;;  %s344_s2 = inlined_call_operand.vmem [shape: f32[1,32], index: 2, kind: input, shape index: {}]   ;;  %s345_s4 = inlined_call_operand.vmem [shape: f32[1,128], index: 4, kind: input, shape index: {}]   ;;  %s346_s5 = inlined_call_operand.vmem [shape: f32[32,128], index: 5, kind: output, shape index: {}]  }
   0x1   :  { %v257_v0 = vld [vmem:[%s341_s1 + $0x18] sm:$0xff]   ;;  %v258_v1 = vld [vmem:[%s341_s1 + $0x10] sm:$0xff]   ;;  %v259_v2 = vld [vmem:[%s341_s1 + $0x8] sm:$0xff]  }
   0x2   :  { %237 = vmatprep.subr.bf16.mxu0 %v257_v0  ;;  %v21_v3 = vld [vmem:[%s342_s0] sm:$0xff]  ;;  %v22_v4 = vld [vmem:[%s342_s0 + $0x8] sm:$0xff]  ;;  %v23_v7 = vld [vmem:[%s342_s0 + $0x10] sm:$0xff] }
   0x3   :  { %238 = vmatpush3.bf16.msra.mxu0 %v257_v0  ;;  %v25_v5 = vpack.c.bf16 %v22_v4, %v21_v3  ;;  %v260_v6 = vld [vmem:[%s341_s1] sm:$0xff]   ;;  %v24_v8 = vld [vmem:[%s342_s0 + $0x18] sm:$0xff]  ;;  %v261_v10 = vld [vmem:[%s343_s3 + $0x8] sm:$0xff]  }
   0x4   :  { %239 = vmatprep.subr.bf16.mxu0 %v258_v1  ;;  %v26_v9 = vpack.c.bf16 %v24_v8, %v23_v7  ;;  %249 = vmatprep.subr.bf16.mxu1 %v261_v10  ;;  %v262_v11 = vld [vmem:[%s343_s3] sm:$0xff]  }
   0x5   :  { %245 = vmatprep.mubr.msk.bf16.mxu0 %vm66_vm0, %v25_v5  ;;  %250 = vmatpush3.bf16.msra.mxu1 %v261_v10  ;;  %v215_v14 = vld [vmem:[%s344_s2] ss:$0 sm:$0xff] }
   0x6   :  { %251 = vmatprep.subr.bf16.mxu1 %v262_v11  ;;  %v222_v27 = vld [vmem:[%s345_s4] ss:$0 sm:$0xff] }
   0x7   :  { %240 = vmatpush3.bf16.msra.mxu0 %v258_v1 }
   0x8   :  { %241 = vmatprep.subr.bf16.mxu0 %v259_v2 }
   0x9   :  { %252 = vmatpush3.bf16.msra.mxu1 %v262_v11 }
   0xb   :  { %242 = vmatpush3.bf16.msra.mxu0 %v259_v2 }
   0xc   :  { %243 = vmatprep.subr.bf16.mxu0 %v260_v6 }
   0xf   :  { %244 = vmatpush3.bf16.msra.mxu0 %v260_v6 }
  0x12   :  { %246 = vmatmul.mubr.msk.bf16.vlgmr.msra.gmra.mxu0 %vm66_vm0, %v26_v9 }
  0xd2   :  { %v247_v12 = vpop.f32.mrf.mxu0 }
  0xd3   :  { %v116_v18 = vadd.f32 %v247_v12, %v215_v14 }
  0xd4   :  { %v107_v13 = vpop.f32.mrf.mxu0 }
  0xd5   :  { %v108_v16 = vadd.f32 %v215_v14, %v107_v13  ;;  %v124_v24 = vmax.f32 %v116_v18, 0.0 }
  0xd6   :  { %v248_v15 = vpop.f32.mrf.mxu0 }
  0xd7   :  { %v119_v17 = vadd.f32 %v248_v15, %v215_v14  ;;  %v122_v22 = vmax.f32 %v108_v16, 0.0 }
  0xd8   :  { %v110_v19 = vpop.f32.mrf.mxu0 }
  0xd9   :  { %v111_v20 = vadd.f32 %v215_v14, %v110_v19  ;;  %v125_v21 = vmax.f32 %v119_v17, 0.0 }
  0xdb   :  { %v123_v23 = vmax.f32 %v111_v20, 0.0  ;;  %v127_v26 = vpack.c.bf16 %v125_v21, %v124_v24 }
  0xdd   :  { %v126_v25 = vpack.c.bf16 %v123_v23, %v122_v22 }
  0xdf   :  { %253 = vmatprep.mubr.msk.bf16.mxu1 %vm151_vm1, %v126_v25 }
  0xe0   :  { %254 = vmatmul.mubr.msk.bf16.vlgmr.msra.gmra.mxu1 %vm151_vm1, %v127_v26 }
 0x1a0   :  { %v255_v28 = vpop.f32.mrf.mxu1 }
 0x1a1   :  { %v201_v29 = vadd.f32 %v255_v28, %v222_v27 }
 0x1a2   :  { %v192_v30 = vpop.f32.mrf.mxu1 }
 0x1a3   :  { %209 = vst [vmem:[%s346_s5 + $0x10] sm:$0xff] %v201_v29  ;;  %v193_v31 = vadd.f32 %v222_v27, %v192_v30 }
 0x1a4   :  { %v256_v32 = vpop.f32.mrf.mxu1 }
 0x1a5   :  { %207 = vst [vmem:[%s346_s5] sm:$0xff] %v193_v31  ;;  %v204_v33 = vadd.f32 %v256_v32, %v222_v27 }
 0x1a6   :  { %v195_v34 = vpop.f32.mrf.mxu1 }
 0x1a7   :  { %210 = vst [vmem:[%s346_s5 + $0x18] sm:$0xff] %v204_v33  ;;  %v196_v35 = vadd.f32 %v222_v27, %v195_v34 }
 0x1a9   :  { %208 = vst [vmem:[%s346_s5 + $0x8] sm:$0xff] %v196_v35 }

</bundles_post_ra>
